<compile_context>
chip_gen: v5e
topology: v5e:2x2
jax: 0.10.0
libtpu: 0.0.40
codegen_flags: <defaults>
</compile_context>

<pallas_src>
import functools

import jax
import jax.numpy as jnp
from jax.experimental import pallas as pl
from jax.experimental.pallas import tpu as pltpu

_MIB = 1024 * 1024
_CHUNK_THRESHOLD_BYTES = 1 * _MIB   # below this: one DMA descriptor is enough
_MAX_CHUNKS = 4                     # a few outstanding DMAs overlap read/write


def _dma_copy_kernel(x_ref, o_ref, sems, *, n_chunks, rows_per_chunk, n_rows):
    """Direct HBM->HBM copy on the DMA engine (no VMEM staging)."""
    copies = []
    for c in range(n_chunks):                      # static unroll at trace time
        start = c * rows_per_chunk
        rows = min(rows_per_chunk, n_rows - start)
        cp = pltpu.make_async_copy(
            x_ref.at[pl.ds(start, rows)],
            o_ref.at[pl.ds(start, rows)],
            sems.at[c],
        )
        cp.start()
        copies.append(cp)
    for cp in copies:
        cp.wait()


def _chunking(n_rows: int, row_bytes: int, itemsize: int):
    """Pick (n_chunks, rows_per_chunk) for overlapping DMAs."""
    total = n_rows * row_bytes
    if total <= _CHUNK_THRESHOLD_BYTES or n_rows < 2:
        return 1, n_rows
    n_chunks = min(_MAX_CHUNKS, n_rows)
    rows = -(-n_rows // n_chunks)                  # ceil divide
    # Align chunk boundaries to the dtype's packed sublane tile
    # (8 rows f32, 16 bf16, 32 int8) so DMA slabs stay tile-aligned.
    sub = 8 * max(1, 4 // max(1, itemsize))
    if n_rows >= sub * n_chunks:
        rows = -(-rows // sub) * sub
    n_chunks = -(-n_rows // rows)
    return n_chunks, rows


def embedding_encoder_forward(weight: jax.Array, *, copy: bool = True) -> jax.Array:
    """EmbeddingEncoder.forward(): return the (N, H) embedding weight.

    The op is a pure identity.  copy=False returns the weight with zero HBM
    traffic (production choice).  copy=True materializes a fresh buffer via a
    direct HBM->HBM DMA Pallas kernel.
    """
    if not copy:
        return weight

    N, H = weight.shape
    itemsize = jnp.dtype(weight.dtype).itemsize
    total_bytes = N * H * itemsize
    n_chunks, rows_per_chunk = _chunking(N, H * itemsize, itemsize)

    kernel = functools.partial(
        _dma_copy_kernel,
        n_chunks=n_chunks,
        rows_per_chunk=rows_per_chunk,
        n_rows=N,
    )

    return pl.pallas_call(
        kernel,
        out_shape=jax.ShapeDtypeStruct((N, H), weight.dtype),
        in_specs=[pl.BlockSpec(memory_space=pl.ANY)],
        out_specs=pl.BlockSpec(memory_space=pl.ANY),
        scratch_shapes=[pltpu.SemaphoreType.DMA((n_chunks,))],
        cost_estimate=pl.CostEstimate(
            flops=0, transcendentals=0, bytes_accessed=2 * total_bytes),
    )(weight)


class EmbeddingEncoder:
    """JAX/Pallas port of the PyTorch EmbeddingEncoder module."""

    def __init__(self, N, H, pretrained_emb=None, *, key=None):
        if pretrained_emb is not None:
            print("Using pretrained node embedding!")
            self.weight = jnp.asarray(pretrained_emb, dtype=jnp.float32)
        else:
            # nn.Embedding default init: weight ~ Normal(0, 1)
            if key is None:
                key = jax.random.PRNGKey(0)
            self.weight = jax.random.normal(key, (N, H), dtype=jnp.float32)

    def forward(self, pretrained_emb=None):
        if pretrained_emb is not None:
            print("Using pretrained node embedding!")
            self.weight = jnp.asarray(pretrained_emb, dtype=jnp.float32)
        # Materialize via the Pallas DMA kernel (copy=False would be the
        # zero-cost identity path).
        return embedding_encoder_forward(self.weight)

    __call__ = forward


if __name__ == "__main__":
    # Small shapes consistent with the module: N=8 nodes, H=32 embedding dim.
    N, H = 8, 32
    key = jax.random.PRNGKey(0)

    enc = EmbeddingEncoder(N, H, key=key)
    out = jax.block_until_ready(enc())

    # Correctness: forward() must return the weight matrix exactly.
    assert out.shape == (N, H), out.shape
    assert out.dtype == jnp.float32, out.dtype
    assert bool(jnp.array_equal(out, enc.weight))

    # Pretrained-embedding path (copy into weight, then return it).
    pretrained = jax.random.normal(jax.random.PRNGKey(1), (N, H), dtype=jnp.float32)
    out2 = jax.block_until_ready(enc(pretrained))
    assert bool(jnp.array_equal(out2, pretrained))

    # Identity fast path: no copy, no HBM traffic.
    out_id = embedding_encoder_forward(enc.weight, copy=False)
    assert out_id is enc.weight

    # Odd H (not a multiple of 128): the DMA copy needs no lane-dense view.
    w_odd = jax.random.normal(jax.random.PRNGKey(2), (257, 300), dtype=jnp.float32)
    out3 = jax.block_until_ready(embedding_encoder_forward(w_odd))
    assert bool(jnp.array_equal(out3, w_odd))

    # Moderate bf16 table (2 MiB) -> chunked (4 overlapping DMAs) path.
    w_bf16 = jax.random.normal(
        jax.random.PRNGKey(3), (4096, 256), dtype=jnp.float32).astype(jnp.bfloat16)
    out4 = jax.block_until_ready(embedding_encoder_forward(w_bf16))
    assert out4.dtype == jnp.bfloat16
    assert bool(jnp.array_equal(out4, w_bf16))

    print("KERNEL_OK")
</pallas_src>

<mosaic_0001>
module attributes {stable_mosaic.version = 11 : i64} {
  func.func @_dma_copy_kernel(%arg0: memref<8x32xf32, #tpu.memory_space<any>>, %arg1: memref<8x32xf32, #tpu.memory_space<any>>, %arg2: memref<1x!tpu.dma_semaphore, #tpu.memory_space<semaphore_mem>>) attributes {dimension_semantics = [], scalar_prefetch = 0 : i64, scratch_operands = 1 : i64, tpu.core_type = #tpu.core_type<tc>} {
    %c0_i32 = arith.constant 0 : i32
    %c0_i32_0 = arith.constant 0 : i32
    %c0_i32_1 = arith.constant 0 : i32
    %0 = tpu.memref_slice %arg0[%c0_i32_0, %c0_i32_1] : memref<8x32xf32, #tpu.memory_space<any>> -> memref<8x32xf32, #tpu.memory_space<any>>
    %c0_i32_2 = arith.constant 0 : i32
    %c0_i32_3 = arith.constant 0 : i32
    %1 = tpu.memref_slice %arg1[%c0_i32_2, %c0_i32_3] : memref<8x32xf32, #tpu.memory_space<any>> -> memref<8x32xf32, #tpu.memory_space<any>>
    %2 = tpu.memref_slice %arg2[%c0_i32] : memref<1x!tpu.dma_semaphore, #tpu.memory_space<semaphore_mem>> -> memref<1x!tpu.dma_semaphore, #tpu.memory_space<semaphore_mem>>
    %3 = tpu.memref_squeeze %2 : memref<1x!tpu.dma_semaphore, #tpu.memory_space<semaphore_mem>> -> memref<!tpu.dma_semaphore, #tpu.memory_space<semaphore_mem>>
    tpu.enqueue_dma source(%0 : memref<8x32xf32, #tpu.memory_space<any>>) target(%1 : memref<8x32xf32, #tpu.memory_space<any>>) target_semaphore(%3 : memref<!tpu.dma_semaphore, #tpu.memory_space<semaphore_mem>>)
    %c0_i32_4 = arith.constant 0 : i32
    %c0_i32_5 = arith.constant 0 : i32
    %c0_i32_6 = arith.constant 0 : i32
    %4 = tpu.memref_slice %arg0[%c0_i32_5, %c0_i32_6] : memref<8x32xf32, #tpu.memory_space<any>> -> memref<8x32xf32, #tpu.memory_space<any>>
    %c0_i32_7 = arith.constant 0 : i32
    %c0_i32_8 = arith.constant 0 : i32
    %5 = tpu.memref_slice %arg1[%c0_i32_7, %c0_i32_8] : memref<8x32xf32, #tpu.memory_space<any>> -> memref<8x32xf32, #tpu.memory_space<any>>
    %6 = tpu.memref_slice %arg2[%c0_i32_4] : memref<1x!tpu.dma_semaphore, #tpu.memory_space<semaphore_mem>> -> memref<1x!tpu.dma_semaphore, #tpu.memory_space<semaphore_mem>>
    %7 = tpu.memref_squeeze %6 : memref<1x!tpu.dma_semaphore, #tpu.memory_space<semaphore_mem>> -> memref<!tpu.dma_semaphore, #tpu.memory_space<semaphore_mem>>
    tpu.wait_dma2 semaphore(%7 : memref<!tpu.dma_semaphore, #tpu.memory_space<semaphore_mem>>) src(%4 : memref<8x32xf32, #tpu.memory_space<any>>) dst(%5 : memref<8x32xf32, #tpu.memory_space<any>>)
    return
  }
}

</mosaic_0001>

<bundles_post_ra>
// kernel: tpu_custom_call.1
= control target key start
LH: loop header
LB: loop body
LE: loop exit
PB: predicated region body
PF: predicated region fallthrough
CT: control target
= control target key end

     0   :  { %s32_s12 = smov [#allocation2]   ;;  %s33_s13 = smov [#allocation3]   ;;  %s51_s0 = inlined_call_operand.hbm [shape: f32[8,32], index: 0, kind: input, shape index: {}]   ;;  %s52_s1 = inlined_call_operand.hbm [shape: f32[8,32], index: 1, kind: output, shape index: {}]  }
   0x1   :  { %s10_s8 = sshll.u32 %s51_s0, 4  ;;  %s12_s11 = sshll.u32 %s52_s1, 4  ;;  %s11_s8 = int_to_ptr.hbm [resolvable:$true] %s10_s8  ;;  %s13_s11 = int_to_ptr.hbm [resolvable:$true] %s12_s11 }
   0x2   :  { %s34_s14 = smov 0  }
   0x3   :  { %16 = dma.general %s11_s8, 128, %s13_s11, %s32_s12, %s33_s13, [#allocation4], %s34_s14, 0  }
   0x4   :  { %30 = dma.done.wait [#allocation2], 128 }
   0x5   :  { %31 = vsyncadd [#allocation2], 4294967168 }
   0x6   :  { %20 = vsyncmov [#allocation2] }
   0x9   :  { %s21_s15 = vpop.sfrf %20 }
   0xa   :  { %p26_p0 = scmp.ne.s32.totalorder %s21_s15, 0 }
   0xc   :  { %25 = shalt.err (%p26_p0)  }

</bundles_post_ra>
